<compile_context>
chip_gen: v7x
topology: tpu7x:2x2x1
jax: 0.10.0
libtpu: 0.0.40
codegen_flags: <defaults>
</compile_context>

<pallas_src>
import math

import jax
import jax.numpy as jnp
from jax.experimental import pallas as pl
from jax.experimental.pallas import tpu as pltpu


def _tree_sum(terms):
    """Balanced-tree sum: halves dependent-add depth vs. a serial chain."""
    terms = list(terms)
    while len(terms) > 1:
        nxt = [terms[i] + terms[i + 1] for i in range(0, len(terms) - 1, 2)]
        if len(terms) % 2:
            nxt.append(terms[-1])
        terms = nxt
    return terms[0]


def _lstm_stacked_kernel(x_ref, labels_ref, w_ref, b_ref, ret_ref, loss_ref):
    """Kernel refs:
      x_ref:      (B, I)        float32
      labels_ref: (B, T*H)      float32   (t-major flattening of (B, T, H))
      w_ref:      (L, I+H, 4H)  float32   fused [x; h] projection, gate columns
                                          ordered (i, f, o, g); i/f/o columns
                                          pre-scaled by 0.5 (sigmoid-as-tanh)
      b_ref:      (L, 1, 4H)    float32   fused bias b_ih + b_hh, same order /
                                          scaling as w_ref
      ret_ref:    (B, T*H)      float32   output (t-major), reshaped in wrapper
      loss_ref:   (1,)          float32   SMEM scalar (MSE over all elements)
    """
    B, I = x_ref.shape
    L = w_ref.shape[0]
    fourH = w_ref.shape[2]
    H = fourH // 4
    IH = I + H
    T = labels_ref.shape[1] // H

    out = x_ref[...]
    hs = [jnp.zeros((B, H), jnp.float32) for _ in range(L)]
    cs = [jnp.zeros((B, H), jnp.float32) for _ in range(L)]

    # Hoisted per-layer constants: fused-projection rows broadcast to the
    # (B, 4H) tile once, bias broadcast once.  (JAX does not CSE
    # broadcast_in_dim, so these must not live inside the t-loop.  At larger
    # L/IH these would move to stride-0 sublane-broadcast loads to avoid
    # vreg-pressure scaling; at L*IH = 4 they are a handful of vregs.)
    w_rows = []
    biases = []
    for l in range(L):
        w_l = w_ref[l]                                        # (I+H, 4H)
        w_rows.append([jnp.broadcast_to(w_l[k:k + 1, :], (B, fourH))
                       for k in range(IH)])
        biases.append(jnp.broadcast_to(b_ref[l], (B, fourH)))

    outs = []
    for _t in range(T):                    # unroll_for (static, tiny)
        for l in range(L):                 # stacked LSTM cells (static, tiny)
            # Fused pre-activation z = [out, h_l] @ W_l + b_l, expanded as VPU
            # broadcast multiply-adds and summed with a balanced tree so the
            # independent products overlap and the dependent-add depth on the
            # serial recurrence chain is minimal.
            cols = [out[:, k:k + 1] for k in range(I)] + \
                   [hs[l][:, k:k + 1] for k in range(H)]
            z = _tree_sum([cols[k] * w_rows[l][k] for k in range(IH)]
                          + [biases[l]])                      # (B, 4H)

            # ONE full-width tanh (single EUP push).  The i/f/o columns were
            # pre-scaled by 0.5 host-side, so 0.5*a + 0.5 recovers their
            # sigmoids; the g block (unscaled) is read straight from a.
            a = jnp.tanh(z)                                   # (B, 4H)
            s = a * 0.5 + 0.5                                 # sigmoid(i,f,o)
            i_g = s[:, 0:H]
            f_g = s[:, H:2 * H]
            o_g = s[:, 2 * H:3 * H]
            g = a[:, 3 * H:]                                  # tanh gate

            c_new = f_g * cs[l] + i_g * g
            cs[l] = c_new
            hs[l] = o_g * jnp.tanh(c_new)                     # 2nd EUP push
            out = hs[l]
        outs.append(out)

    # Single lane-dense store of the stacked outputs + one fused MSE reduce.
    ret = jnp.concatenate(outs, axis=1)                       # (B, T*H)
    ret_ref[...] = ret
    diff = ret - labels_ref[...]
    loss_ref[0] = jnp.sum(diff * diff) * (1.0 / (B * T * H))


def prepare_lstm_params(w_ih, w_hh, b_ih, b_hh):
    """ONE-TIME parameter prep (off the per-call path).

    w_ih: (L, 4H, I); w_hh: (L, 4H, H); b_ih, b_hh: (L, 4H), all in PyTorch
    gate order (i, f, g, o).  Returns:
      w_fused: (L, I+H, 4H) float32 -- [W_ih | W_hh] fused along the input
               dim, gate blocks reordered to (i, f, o, g), i/f/o columns
               scaled by 0.5 (sigmoid-as-tanh fold), transposed so the kernel
               does one lane-wide projection with no in-kernel transposes.
      b_fused: (L, 1, 4H) float32 -- b_ih + b_hh, same reorder / scaling.
    """
    L, fourH, I = w_ih.shape
    H = fourH // 4
    perm = [0, 1, 3, 2]                       # (i, f, g, o) -> (i, f, o, g)
    scale = jnp.array([0.5, 0.5, 0.5, 1.0], jnp.float32)   # per gate block

    w = jnp.concatenate([w_ih, w_hh], axis=2).astype(jnp.float32)  # (L,4H,I+H)
    w = w.reshape(L, 4, H, I + H)[:, perm, :, :] * scale[None, :, None, None]
    w = w.reshape(L, fourH, I + H)
    w_fused = jnp.transpose(w, (0, 2, 1))                          # (L,I+H,4H)

    b = (b_ih + b_hh).astype(jnp.float32).reshape(L, 4, H)
    b = b[:, perm, :] * scale[None, :, None]
    b_fused = b.reshape(L, 1, fourH)
    return w_fused, b_fused


def lstm_stacked_forward(x, labels, w_fused, b_fused):
    """x: (B, I); labels: (B, T, H); w_fused/b_fused from prepare_lstm_params.
    Returns (ret, loss): ret (B, T, H) float32, loss () float32."""
    B, I = x.shape
    L, IH, fourH = w_fused.shape
    H = fourH // 4
    T = labels.shape[1]

    labels_flat = labels.astype(jnp.float32).reshape(B, T * H)

    vmem = pl.BlockSpec(memory_space=pltpu.MemorySpace.VMEM)
    smem = pl.BlockSpec(memory_space=pltpu.MemorySpace.SMEM)
    ret_flat, loss = pl.pallas_call(
        _lstm_stacked_kernel,
        out_shape=(jax.ShapeDtypeStruct((B, T * H), jnp.float32),
                   jax.ShapeDtypeStruct((1,), jnp.float32)),
        in_specs=[vmem, vmem, vmem, vmem],
        out_specs=(vmem, smem),
    )(x.astype(jnp.float32), labels_flat, w_fused, b_fused)
    return ret_flat.reshape(B, T, H), loss[0]


def _reference_forward(x, labels, w_ih, w_hh, b_ih, b_hh):
    """Pure-JAX reference reproducing the PyTorch module semantics."""
    L, fourH, _ = w_ih.shape
    H = fourH // 4
    B = x.shape[0]
    T = labels.shape[1]
    hs = [jnp.zeros((B, H), jnp.float32) for _ in range(L)]
    cs = [jnp.zeros((B, H), jnp.float32) for _ in range(L)]
    out = x
    rets = []
    for _ in range(T):
        for l in range(L):
            gates = (out @ w_ih[l].T + hs[l] @ w_hh[l].T
                     + (b_ih[l] + b_hh[l])[None, :])
            i_g = jax.nn.sigmoid(gates[:, 0 * H:1 * H])
            f_g = jax.nn.sigmoid(gates[:, 1 * H:2 * H])
            g_g = jnp.tanh(gates[:, 2 * H:3 * H])
            o_g = jax.nn.sigmoid(gates[:, 3 * H:4 * H])
            cs[l] = f_g * cs[l] + i_g * g_g
            hs[l] = o_g * jnp.tanh(cs[l])
            out = hs[l]
        rets.append(out)
    ret = jnp.stack(rets, axis=1)
    loss = jnp.mean((ret - labels) ** 2)
    return ret, loss


if __name__ == "__main__":
    # Module config: input_size = hidden_size = 2, num_lstm = 1, unroll_for = 2.
    B, I, H = 8, 2, 2
    L, T = 1, 2

    key = jax.random.PRNGKey(0)
    kx, ky, k1, k2, k3 = jax.random.split(key, 5)

    # PyTorch LSTMCell default init: U(-1/sqrt(H), 1/sqrt(H)); module fixes
    # bias_hh = 0 (kept explicit here and folded host-side).
    bound = 1.0 / math.sqrt(H)
    w_ih = jax.random.uniform(k1, (L, 4 * H, I), jnp.float32, -bound, bound)
    w_hh = jax.random.uniform(k2, (L, 4 * H, H), jnp.float32, -bound, bound)
    b_ih = jax.random.uniform(k3, (L, 4 * H), jnp.float32, -bound, bound)
    b_hh = jnp.zeros((L, 4 * H), jnp.float32)

    # inputs = [x], labels = [y] as in the PyTorch forward(inputs, labels).
    x = jax.random.normal(kx, (B, I), jnp.float32)
    y = jax.random.normal(ky, (B, T, H), jnp.float32)

    # One-time parameter prep (constant across calls; off the forward path).
    w_fused, b_fused = prepare_lstm_params(w_ih, w_hh, b_ih, b_hh)
    w_fused = jax.block_until_ready(w_fused)
    b_fused = jax.block_until_ready(b_fused)

    ret, loss = lstm_stacked_forward(x, y, w_fused, b_fused)
    ret = jax.block_until_ready(ret)
    loss = jax.block_until_ready(loss)

    ret_ref, loss_ref = _reference_forward(x, y, w_ih, w_hh, b_ih, b_hh)
    assert ret.shape == (B, T, H)
    assert jnp.allclose(ret, ret_ref, atol=1e-5, rtol=1e-5)
    assert jnp.allclose(loss, loss_ref, atol=1e-5, rtol=1e-5)

    print("KERNEL_OK")
</pallas_src>

<mosaic_0001>
module attributes {stable_mosaic.version = 11 : i64} {
  func.func @_lstm_stacked_kernel(%arg0: memref<8x2xf32, #tpu.memory_space<vmem>>, %arg1: memref<8x4xf32, #tpu.memory_space<vmem>>, %arg2: memref<1x4x8xf32, #tpu.memory_space<vmem>>, %arg3: memref<1x1x8xf32, #tpu.memory_space<vmem>>, %arg4: memref<8x4xf32, #tpu.memory_space<vmem>>, %arg5: memref<1xf32, #tpu.memory_space<smem>>) attributes {dimension_semantics = [], scalar_prefetch = 0 : i64, scratch_operands = 0 : i64, tpu.core_type = #tpu.core_type<tc>} {
    %c0 = arith.constant 0 : index
    %c0_0 = arith.constant 0 : index
    %0 = vector.load %arg0[%c0, %c0_0] : memref<8x2xf32, #tpu.memory_space<vmem>>, vector<8x2xf32>
    %cst = arith.constant 0.000000e+00 : f32
    %1 = vector.broadcast %cst : f32 to vector<8x2xf32>
    %cst_1 = arith.constant 0.000000e+00 : f32
    %2 = vector.broadcast %cst_1 : f32 to vector<8x2xf32>
    %c0_2 = arith.constant 0 : index
    %c0_3 = arith.constant 0 : index
    %c0_4 = arith.constant 0 : index
    %3 = vector.load %arg2[%c0_2, %c0_3, %c0_4] : memref<1x4x8xf32, #tpu.memory_space<vmem>>, vector<1x4x8xf32>
    %4 = vector.shape_cast %3 : vector<1x4x8xf32> to vector<4x8xf32>
    %5 = vector.extract_strided_slice %4 {offsets = [0, 0], sizes = [1, 8], strides = [1, 1]} : vector<4x8xf32> to vector<1x8xf32>
    %6 = vector.shape_cast %5 : vector<1x8xf32> to vector<1x8xf32>
    %7 = vector.broadcast %6 : vector<1x8xf32> to vector<8x8xf32>
    %8 = vector.extract_strided_slice %4 {offsets = [1, 0], sizes = [1, 8], strides = [1, 1]} : vector<4x8xf32> to vector<1x8xf32>
    %9 = vector.shape_cast %8 : vector<1x8xf32> to vector<1x8xf32>
    %10 = vector.broadcast %9 : vector<1x8xf32> to vector<8x8xf32>
    %11 = vector.extract_strided_slice %4 {offsets = [2, 0], sizes = [1, 8], strides = [1, 1]} : vector<4x8xf32> to vector<1x8xf32>
    %12 = vector.shape_cast %11 : vector<1x8xf32> to vector<1x8xf32>
    %13 = vector.broadcast %12 : vector<1x8xf32> to vector<8x8xf32>
    %14 = vector.extract_strided_slice %4 {offsets = [3, 0], sizes = [1, 8], strides = [1, 1]} : vector<4x8xf32> to vector<1x8xf32>
    %15 = vector.shape_cast %14 : vector<1x8xf32> to vector<1x8xf32>
    %16 = vector.broadcast %15 : vector<1x8xf32> to vector<8x8xf32>
    %c0_5 = arith.constant 0 : index
    %c0_6 = arith.constant 0 : index
    %c0_7 = arith.constant 0 : index
    %17 = vector.load %arg3[%c0_5, %c0_6, %c0_7] : memref<1x1x8xf32, #tpu.memory_space<vmem>>, vector<1x1x8xf32>
    %18 = vector.shape_cast %17 : vector<1x1x8xf32> to vector<1x8xf32>
    %19 = vector.shape_cast %18 : vector<1x8xf32> to vector<1x8xf32>
    %20 = vector.broadcast %19 : vector<1x8xf32> to vector<8x8xf32>
    %21 = vector.extract_strided_slice %0 {offsets = [0, 0], sizes = [8, 1], strides = [1, 1]} : vector<8x2xf32> to vector<8x1xf32>
    %22 = vector.extract_strided_slice %0 {offsets = [0, 1], sizes = [8, 1], strides = [1, 1]} : vector<8x2xf32> to vector<8x1xf32>
    %23 = vector.extract_strided_slice %1 {offsets = [0, 0], sizes = [8, 1], strides = [1, 1]} : vector<8x2xf32> to vector<8x1xf32>
    %24 = vector.extract_strided_slice %1 {offsets = [0, 1], sizes = [8, 1], strides = [1, 1]} : vector<8x2xf32> to vector<8x1xf32>
    %25 = vector.broadcast %21 : vector<8x1xf32> to vector<8x8xf32>
    %26 = arith.mulf %25, %7 : vector<8x8xf32>
    %27 = vector.broadcast %22 : vector<8x1xf32> to vector<8x8xf32>
    %28 = arith.mulf %27, %10 : vector<8x8xf32>
    %29 = vector.broadcast %23 : vector<8x1xf32> to vector<8x8xf32>
    %30 = arith.mulf %29, %13 : vector<8x8xf32>
    %31 = vector.broadcast %24 : vector<8x1xf32> to vector<8x8xf32>
    %32 = arith.mulf %31, %16 : vector<8x8xf32>
    %33 = arith.addf %26, %28 : vector<8x8xf32>
    %34 = arith.addf %30, %32 : vector<8x8xf32>
    %35 = arith.addf %33, %34 : vector<8x8xf32>
    %36 = arith.addf %35, %20 : vector<8x8xf32>
    %37 = math.tanh %36 : vector<8x8xf32>
    %cst_8 = arith.constant 5.000000e-01 : f32
    %38 = vector.broadcast %cst_8 : f32 to vector<8x8xf32>
    %39 = arith.mulf %37, %38 : vector<8x8xf32>
    %cst_9 = arith.constant 5.000000e-01 : f32
    %40 = vector.broadcast %cst_9 : f32 to vector<8x8xf32>
    %41 = arith.addf %39, %40 : vector<8x8xf32>
    %42 = vector.extract_strided_slice %41 {offsets = [0, 0], sizes = [8, 2], strides = [1, 1]} : vector<8x8xf32> to vector<8x2xf32>
    %43 = vector.extract_strided_slice %41 {offsets = [0, 2], sizes = [8, 2], strides = [1, 1]} : vector<8x8xf32> to vector<8x2xf32>
    %44 = vector.extract_strided_slice %41 {offsets = [0, 4], sizes = [8, 2], strides = [1, 1]} : vector<8x8xf32> to vector<8x2xf32>
    %45 = vector.extract_strided_slice %37 {offsets = [0, 6], sizes = [8, 2], strides = [1, 1]} : vector<8x8xf32> to vector<8x2xf32>
    %46 = arith.mulf %43, %2 : vector<8x2xf32>
    %47 = arith.mulf %42, %45 : vector<8x2xf32>
    %48 = arith.addf %46, %47 : vector<8x2xf32>
    %49 = math.tanh %48 : vector<8x2xf32>
    %50 = arith.mulf %44, %49 : vector<8x2xf32>
    %51 = vector.extract_strided_slice %50 {offsets = [0, 0], sizes = [8, 1], strides = [1, 1]} : vector<8x2xf32> to vector<8x1xf32>
    %52 = vector.extract_strided_slice %50 {offsets = [0, 1], sizes = [8, 1], strides = [1, 1]} : vector<8x2xf32> to vector<8x1xf32>
    %53 = vector.extract_strided_slice %50 {offsets = [0, 0], sizes = [8, 1], strides = [1, 1]} : vector<8x2xf32> to vector<8x1xf32>
    %54 = vector.extract_strided_slice %50 {offsets = [0, 1], sizes = [8, 1], strides = [1, 1]} : vector<8x2xf32> to vector<8x1xf32>
    %55 = vector.broadcast %51 : vector<8x1xf32> to vector<8x8xf32>
    %56 = arith.mulf %55, %7 : vector<8x8xf32>
    %57 = vector.broadcast %52 : vector<8x1xf32> to vector<8x8xf32>
    %58 = arith.mulf %57, %10 : vector<8x8xf32>
    %59 = vector.broadcast %53 : vector<8x1xf32> to vector<8x8xf32>
    %60 = arith.mulf %59, %13 : vector<8x8xf32>
    %61 = vector.broadcast %54 : vector<8x1xf32> to vector<8x8xf32>
    %62 = arith.mulf %61, %16 : vector<8x8xf32>
    %63 = arith.addf %56, %58 : vector<8x8xf32>
    %64 = arith.addf %60, %62 : vector<8x8xf32>
    %65 = arith.addf %63, %64 : vector<8x8xf32>
    %66 = arith.addf %65, %20 : vector<8x8xf32>
    %67 = math.tanh %66 : vector<8x8xf32>
    %cst_10 = arith.constant 5.000000e-01 : f32
    %68 = vector.broadcast %cst_10 : f32 to vector<8x8xf32>
    %69 = arith.mulf %67, %68 : vector<8x8xf32>
    %cst_11 = arith.constant 5.000000e-01 : f32
    %70 = vector.broadcast %cst_11 : f32 to vector<8x8xf32>
    %71 = arith.addf %69, %70 : vector<8x8xf32>
    %72 = vector.extract_strided_slice %71 {offsets = [0, 0], sizes = [8, 2], strides = [1, 1]} : vector<8x8xf32> to vector<8x2xf32>
    %73 = vector.extract_strided_slice %71 {offsets = [0, 2], sizes = [8, 2], strides = [1, 1]} : vector<8x8xf32> to vector<8x2xf32>
    %74 = vector.extract_strided_slice %71 {offsets = [0, 4], sizes = [8, 2], strides = [1, 1]} : vector<8x8xf32> to vector<8x2xf32>
    %75 = vector.extract_strided_slice %67 {offsets = [0, 6], sizes = [8, 2], strides = [1, 1]} : vector<8x8xf32> to vector<8x2xf32>
    %76 = arith.mulf %73, %48 : vector<8x2xf32>
    %77 = arith.mulf %72, %75 : vector<8x2xf32>
    %78 = arith.addf %76, %77 : vector<8x2xf32>
    %79 = math.tanh %78 : vector<8x2xf32>
    %80 = arith.mulf %74, %79 : vector<8x2xf32>
    %81 = tpu.concatenate %50, %80 in 1 : vector<8x2xf32>, vector<8x2xf32> -> vector<8x4xf32>
    %c0_12 = arith.constant 0 : index
    %c0_13 = arith.constant 0 : index
    %82 = vector.load %arg4[%c0_12, %c0_13] : memref<8x4xf32, #tpu.memory_space<vmem>>, vector<8x4xf32>
    tpu.vector_store %arg4[%c0_12, %c0_13], %81 {strides = array<i32>} : memref<8x4xf32, #tpu.memory_space<vmem>>, vector<8x4xf32>,
    %c0_14 = arith.constant 0 : index
    %c0_15 = arith.constant 0 : index
    %83 = vector.load %arg1[%c0_14, %c0_15] : memref<8x4xf32, #tpu.memory_space<vmem>>, vector<8x4xf32>
    %84 = arith.subf %81, %83 : vector<8x4xf32>
    %85 = arith.mulf %84, %84 : vector<8x4xf32>
    %86 = vector.shape_cast %85 : vector<8x4xf32> to vector<1x8x4xf32>
    %cst_16 = arith.constant dense<0.000000e+00> : vector<1xf32>
    %87 = vector.multi_reduction <add>, %86, %cst_16 [1, 2] : vector<1x8x4xf32> to vector<1xf32>
    %88 = vector.shape_cast %87 : vector<1xf32> to vector<1x1x1xf32>
    %89 = vector.extract %88[0, 0, 0] : f32 from vector<1x1x1xf32>
    %cst_17 = arith.constant 3.125000e-02 : f32
    %90 = arith.mulf %89, %cst_17 : f32
    %c0_18 = arith.constant 0 : index
    %91 = memref.load %arg5[%c0_18] : memref<1xf32, #tpu.memory_space<smem>>
    memref.store %90, %arg5[%c0_18] : memref<1xf32, #tpu.memory_space<smem>>
    return
  }
}

</mosaic_0001>

<bundles_post_ra>
// kernel: tpu_custom_call.1
= control target key start
LH: loop header
LB: loop body
LE: loop exit
PB: predicated region body
PF: predicated region fallthrough
CT: control target
= control target key end

     0   :  { %v200_v1 = vmov 0   ;;  %s272_s0 = inlined_call_operand.vmem [shape: f32[8,2], index: 0, kind: input, shape index: {}]   ;;  %s273_s1 = inlined_call_operand.vmem [shape: f32[8,4], index: 1, kind: input, shape index: {}]   ;;  %s274_s2 = inlined_call_operand.vmem [shape: f32[1,4,8], index: 2, kind: input, shape index: {}]   ;;  %s275_s3 = inlined_call_operand.vmem [shape: f32[1,1,8], index: 3, kind: input, shape index: {}]   ;;  %s276_s4 = inlined_call_operand.vmem [shape: f32[8,4], index: 4, kind: output, shape index: {0}]   ;;  %s277_s5 = inlined_call_operand.hbm [shape: f32[1], index: 5, kind: output, shape index: {1}]  }
   0x1   :  { %v20_v0 = vld [vmem:[%s272_s0] sm:$0xff]  ;;  %175 = vset.pattern.permute.xlu0 %v200_v1 }
   0x2   :  { %11 = vsyncpa [#allocation3], 0  ;;  %47 = vperm.xlu0 %175, %v20_v0   ;;  %v201_v2 = vmov 1   ;;  %v22_v3 = vlaneseq  ;;  %v21_v7 = vld [vmem:[%s274_s2] sm:$0xf]  ;;  %s202_s2 = smov 122  }
   0x3   :  { %v163_v22 = vld [vmem:[%s275_s3] ss:$0 sm:$0xff]  ;;  %s203_s23 = smov 2   ;;  %v204_v33 = vmov 5   ;;  %v205_v34 = vmov 4   ;;  %s206_s3 = smov 124  }
   0x4   :  { %v23_v4 = vshrl.u32 %v22_v3, 7  ;;  %178 = vset.pattern.permute.xlu1 %v204_v33  ;;  %s207_s24 = smov 126   ;;  %vm126_vm0 = vcmask 15360   ;;  %v130_v59 = vld [vmem:[%s273_s1] sm:$0xff]  ;;  %vm128_vm1 = vcmask 31744   ;;  %s188_s7 = scalar_lea.hbm %s277_s5, 16 }
   0x5   :  { %p189_p0 = scmp.ne.s32.totalorder %s277_s5, %s188_s7  ;;  %p192_p1 = scmp.lt.u32.totalorder %s188_s7, %s277_s5 }
   0x6   :  { %176 = vset.pattern.permute.xlu0 %v201_v2  ;;  %v32_v5 = vsub.s32 2, %v23_v4  ;;  %v36_v6 = vsub.s32 3, %v23_v4  ;;  %v24_v8 = vsub.s32 0, %v23_v4  ;;  %v28_v9 = vsub.s32 1, %v23_v4 }
   0x7   :  { %52 = vperm.xlu0 %176, %v20_v0   ;;  %p194_p2 = pnand %p192_p1, %p189_p0 }
   0x8   :  { %v33_v10 = vrot.slane %v21_v7, %v32_v5  ;;  %v37_v11 = vrot.slane %v21_v7, %v36_v6  ;;  %v25_v13 = vrot.slane %v21_v7, %v24_v8  ;;  %v29_v14 = vrot.slane %v21_v7, %v28_v9 }
   0xa   :  { %v56_v15 = vmul.f32 0.0, %v33_v10  ;;  %v57_v16 = vmul.f32 0.0, %v37_v11 }
   0xb   :  { %177 = vset.pattern.permute.xlu0 %v205_v34 }
   0xc   :  { %v59_v19 = vadd.f32 %v57_v16, %v56_v15 }
  0x81   :  { %v48_v12 = vpop.permute.xlu0 %47 }
  0x82   :  { %v50_v18 = vmul.f32 %v48_v12, %v25_v13 }
  0x86   :  { %v53_v17 = vpop.permute.xlu0 %52 }
  0x87   :  { %v55_v20 = vmul.f32 %v53_v17, %v29_v14 }
  0x89   :  { %v58_v21 = vadd.f32 %v55_v20, %v50_v18 }
  0x8b   :  { %v60_v23 = vadd.f32 %v59_v19, %v58_v21 }
  0x8d   :  { %v61_v24 = vadd.f32 %v163_v22, %v60_v23 }
  0x8f   :  { %180 = vtanh.f32 %v61_v24 }
  0x99   :  { %v181_v25 = vpop.eup %180 }
  0x9a   :  { %67 = vrot.lane.b32.xlu1 %v181_v25, %s202_s2  ;;  %v63_v26 = vmul.f32 0.5, %v181_v25 }
  0x9c   :  { %v64_v27 = vadd.f32 0.5, %v63_v26 }
  0x9e   :  { %v65_v30 = vmul.f32 0.0, %v64_v27 }
 0x10c   :  { %v68_v28 = vpop.permute.xlu1 %67 }
 0x10d   :  { %v70_v29 = vmul.f32 %v68_v28, %v64_v27 }
 0x10f   :  { %72 = vrot.lane.b32.xlu1 %v70_v29, %s203_s23 }
 0x181   :  { %v73_v31 = vpop.permute.xlu1 %72 }
 0x182   :  { %v75_v32 = vadd.f32 %v73_v31, %v65_v30 }
 0x184   :  { %182 = vtanh.f32 %v75_v32 }
 0x18e   :  { %v183_v35 = vpop.eup %182 }
 0x18f   :  { %78 = vrot.lane.b32.xlu1 %v183_v35, %s203_s23 }
 0x201   :  { %v79_v36 = vpop.permute.xlu1 %78 }
 0x202   :  { %v81_v37 = vmul.f32 %v79_v36, %v64_v27 }
 0x204   :  { %89 = vperm.xlu1 %178, %v81_v37   ;;  %84 = vperm.xlu0 %177, %v81_v37  }
 0x208   :  { %179 = vset.pattern.permute.xlu0 %v204_v33 }
 0x283   :  { %v90_v38 = vpop.permute.xlu1 %89  ;;  %v85_v39 = vpop.permute.xlu0 %84 }
 0x284   :  { %v92_v40 = vmul.f32 %v90_v38, %v29_v14  ;;  %v94_v41 = vmul.f32 %v90_v38, %v37_v11  ;;  %v87_v42 = vmul.f32 %v85_v39, %v25_v13  ;;  %v93_v43 = vmul.f32 %v85_v39, %v33_v10 }
 0x286   :  { %v95_v44 = vadd.f32 %v92_v40, %v87_v42  ;;  %v96_v45 = vadd.f32 %v94_v41, %v93_v43 }
 0x288   :  { %v97_v46 = vadd.f32 %v96_v45, %v95_v44 }
 0x28a   :  { %v98_v47 = vadd.f32 %v163_v22, %v97_v46 }
 0x28c   :  { %184 = vtanh.f32 %v98_v47 }
 0x296   :  { %v185_v48 = vpop.eup %184 }
 0x297   :  { %104 = vrot.lane.b32.xlu1 %v185_v48, %s202_s2  ;;  %v100_v49 = vmul.f32 0.5, %v185_v48 }
 0x299   :  { %v101_v50 = vadd.f32 0.5, %v100_v49 }
 0x29b   :  { %v102_v53 = vmul.f32 %v101_v50, %v75_v32 }
 0x309   :  { %v105_v51 = vpop.permute.xlu1 %104 }
 0x30a   :  { %v107_v52 = vmul.f32 %v105_v51, %v101_v50 }
 0x30c   :  { %109 = vrot.lane.b32.xlu0 %v107_v52, %s203_s23 }
 0x310   :  { %119 = vrot.lane.b32.xlu0 %v81_v37, %s206_s3 }
 0x37e   :  { %v110_v54 = vpop.permute.xlu0 %109 }
 0x37f   :  { %v112_v55 = vadd.f32 %v110_v54, %v102_v53 }
 0x381   :  { %186 = vtanh.f32 %v112_v55 }
 0x382   :  { %v120_v60 = vpop.permute.xlu0 %119 }
 0x38b   :  { %v187_v56 = vpop.eup %186 }
 0x38c   :  { %115 = vrot.lane.b32.xlu1 %v187_v56, %s203_s23 }
 0x3fe   :  { %v116_v57 = vpop.permute.xlu1 %115 }
 0x3ff   :  { %v118_v58 = vmul.f32 %v116_v57, %v101_v50 }
 0x401   :  { %123 = vrot.lane.b32.xlu1 %v118_v58, %s207_s24 }
 0x473   :  { %v124_v61 = vpop.permute.xlu1 %123 }
 0x474   :  { %v127_v62 = vsel %vm126_vm0, %v120_v60, %v124_v61 }
 0x475   :  { %v131_v63 = vsub.f32 %v127_v62, %v130_v59  ;;  %129 = vst.msk [vmem:[%s276_s4] sm:$0xff] %vm128_vm1, %v127_v62 }
 0x477   :  { %v132_v0 = vmul.f32 %v131_v63, %v131_v63 }
 0x479   :  { %v133_v1 = vsel %vm128_vm1, %v132_v0, 0.0 }
 0x47a   :  { %134 = vadd.xlane.f32.xlu0 %v133_v1 }
 0x507   :  { %v135_v2 = vpop.xlane.xlu0 %134 }
 0x508   :  { %v136_v3 = vrot.slane %v135_v2, 4 }
 0x50a   :  { %v137_v4 = vadd.f32 %v136_v3, %v135_v2 }
 0x50c   :  { %v138_v5 = vrot.slane %v137_v4, 2 }
 0x50e   :  { %v139_v6 = vadd.f32 %v138_v5, %v137_v4 }
 0x510   :  { %v140_v7 = vrot.slane %v139_v6, 1 }
 0x512   :  { %v141_v8 = vadd.f32 %v140_v7, %v139_v6 }
 0x514   :  { %164 = vpush %v141_v8 }
 0x545   :  { %s165_s1 = spop %164 }
 0x546   :  { %s143_s29 = smul.f32 0.03125, %s165_s1 }
 0x548   :  { %145 = sst [smem:[#allocation2]] %s143_s29 }
 0x549   :  { %197 = shalt.err (!%p194_p2)
}
 0x54a   :  { %s208_s11 = smov [#allocation2]  }
 0x54b   :  { %155 = dma.smem_to_hbm %s208_s11, 16, %s277_s5, [#allocation3]  }
 0x54c   :  { %198 = dma.done.wait [#allocation3], 16  }
 0x54d   :  { %199 = vsyncadd [#allocation3], 4294967280 }
 0x54e   :  { %161 = sfence }
 0x54f   :  { %162 = vsyncpa [#allocation3], 1 }

</bundles_post_ra>
